<compile_context>
chip_gen: v7x
topology: tpu7x:2x2x1
jax: 0.10.0
libtpu: 0.0.40
codegen_flags: <defaults>
</compile_context>

<pallas_src>
import functools
import numpy as np

import jax
import jax.numpy as jnp
from jax import lax
from jax.experimental import pallas as pl
from jax.experimental.pallas import tpu as pltpu

GRID_SHAPE = (31, 51)                  # (h, w) of the saliency / grid maps
PADDING = min(GRID_SHAPE) - 1          # 30
FILT_SIZE = 2 * PADDING + 1            # 61
ATTRACTION_FWHM = 4.0
BANDWIDTH_SCALE = 64.0
AMPLITUDE_SCALE = 1.0
WARP_SCALE = 1.0
ALPHA = BETA = GAMMA = 1.0             # frozen nn.Parameter(tensor(1)) x3

M_MAX = 64                             # fixed box-count padding (shape-stable kernel)
_DEN_OFF = 64                          # lane offset of the 'den' block in gcx/gcy
_Y_INTERP_ROW = 56                     # sublane offset of wyt inside the packed interp

VMEM = pltpu.MemorySpace.VMEM


# ----------------------------------------------------------------------------
# The single fused Pallas kernel
# ----------------------------------------------------------------------------
def _mix_kde_grid_kernel(boxes_sub_ref, boxes_lane_ref, ext_ref, gcx_ref,
                         gcy_ref, interp_ref, params_ref, out_ref,
                         *, h_img, w_img):
    f32 = jnp.float32
    h_g, w_g = GRID_SHAPE

    pr = params_ref[...]                       # (1, 4) runtime params (no recompiles)
    const_add = pr[:, 0:1]                     # (1,1)  summed per-box +1/61^2 term
    alpha = pr[:, 1:2]                         # (1,1)
    amplitude = pr[:, 2:3]                     # (1,1)

    # ---- box parameters: one packed tile per orientation -------------------
    bs = boxes_sub_ref[...]                    # (M_MAX, 8): cx, cy, w, h, mask
    cx_c = bs[:, 0:1]
    cy_c = bs[:, 1:2]
    bw_c = bs[:, 2:3]
    bh_c = bs[:, 3:4]
    msk_c = bs[:, 4:5]
    bl = boxes_lane_ref[...]                   # (8, M_MAX): same fields, boxes on lanes
    cy_r = bl[1:2, :]
    bh_r = bl[3:4, :]

    # Reference bbox2sal convention: the bandwidth (clamp(w*64, min=1)) itself
    # divides the squared distance (not its square).
    inv_wd_c = pl.reciprocal(jnp.maximum(bw_c * BANDWIDTH_SCALE, 1.0), approx=True)
    inv_ht_c = pl.reciprocal(jnp.maximum(bh_c * BANDWIDTH_SCALE, 1.0), approx=True)
    inv_ht_r = pl.reciprocal(jnp.maximum(bh_r * BANDWIDTH_SCALE, 1.0), approx=True)

    # ---- grid coordinates generated in-register (linspace(0, dim, n)) ------
    gx_r = lax.broadcasted_iota(jnp.int32, (1, w_g), 1).astype(f32) * (w_img / (w_g - 1.0))
    gy_r = lax.broadcasted_iota(jnp.int32, (1, h_g), 1).astype(f32) * (h_img / (h_g - 1.0))
    gy_c = lax.broadcasted_iota(jnp.int32, (h_g, 1), 0).astype(f32) * (h_img / (h_g - 1.0))

    # ---- 1) bbox2sal: each box's Gaussian factorises into x-part * y-part --
    dxe = gx_r - cx_c
    ex = jnp.exp(-0.5 * dxe * dxe * inv_wd_c)          # (M, 51)
    dye = gy_r - cy_c
    ey = jnp.exp(-0.5 * dye * dye * inv_ht_c)          # (M, 31)
    dyt = gy_c - cy_r
    eyt = jnp.exp(-0.5 * dyt * dyt * inv_ht_r)         # (31, M)  y-factor, boxes on lanes

    sx = jnp.sum(ex, axis=1, keepdims=True)            # (M, 1)
    sy = jnp.sum(ey, axis=1, keepdims=True)            # (M, 1)  per-box grid sum = sx*sy
    scale = amplitude * msk_c * pl.reciprocal(1e-5 + sx * sy, approx=True)

    # saliency[y, x] = sum_i scale_i * ey_i(y) * ex_i(x)  (+ m/61^2)
    bsal = jnp.dot(eyt, ex * scale, preferred_element_type=f32) + const_add   # (31, 51)
    # NOTE: the reference's `sal /= sal.sum()` is a positive global rescale
    # which the subsequent normalize_image is exactly invariant to -> skipped.

    # ---- 2) normalize_image(bbox_sal) + 'add' fusion, reduced per axis -----
    lo = jnp.min(bsal, keepdims=True)                  # (1, 1)
    rng = jnp.max(bsal, keepdims=True) - lo
    inv_rng = jnp.where(rng > 0.0,
                        pl.reciprocal(jnp.maximum(rng, 1e-30), approx=True),
                        0.0)                           # constant map -> zeros, not NaN
    nb = (bsal - lo) * inv_rng                         # (31, 51)

    # beta*norm(img)+gamma*norm(dset) is a kernel-external constant map; only
    # its two axis sums are needed downstream, precomputed in the wrapper.
    ext_x = ext_ref[0:1, 0:w_g]                        # (1, 51)
    ext_y = ext_ref[1:2, 0:h_g]                        # (1, 31)

    x_sal = alpha * jnp.sum(nb, axis=0, keepdims=True) + ext_x     # (1, 51)

    y_col = alpha * jnp.sum(nb, axis=1, keepdims=True)             # (31, 1)
    # (31,1) column -> (1,31) row via a masked sublane reduction (cheap; avoids
    # an explicit transpose op).
    ii = lax.broadcasted_iota(jnp.int32, (h_g, h_g), 0)
    jj = lax.broadcasted_iota(jnp.int32, (h_g, h_g), 1)
    eye = (ii == jj).astype(f32)
    y_sal = jnp.sum(eye * y_col, axis=0, keepdims=True) + ext_y    # (1, 31)

    # ---- 3) separable saliency -> grid (reflect pad + P-basis + 61-tap conv
    #         folded offline into [num|den] matrices) + 4) align_corners
    #         bilinear resize (folded into the interp matrix) ----------------
    def to_grid(sal, gc, wt, k):
        nd = jnp.dot(sal, gc, preferred_element_type=f32)          # (1, 128)
        num = nd[:, 0:k]
        den = nd[:, _DEN_OFF:_DEN_OFF + k]
        inv_den = jnp.where(den > 0.0,
                            pl.reciprocal(jnp.where(den > 0.0, den, 1.0), approx=True),
                            0.0)                                   # guard 0/0 degenerate case
        g = jnp.clip(num * inv_den * 2.0 - 1.0, -1.0, 1.0)         # (1, k)
        return jnp.dot(g, wt, preferred_element_type=f32)          # (1, L_pad)

    out_ref[0:1, :] = to_grid(x_sal, gcx_ref[...], interp_ref[0:w_g, :], w_g)
    out_ref[1:2, :] = to_grid(y_sal, gcy_ref[...],
                              interp_ref[_Y_INTERP_ROW:_Y_INTERP_ROW + h_g, :], h_g)


# ----------------------------------------------------------------------------
# Offline (numpy) constant builders: folded conv / pad / P-basis / resize
# ----------------------------------------------------------------------------
def _make_1d_gaussian(size, fwhm):
    x = np.arange(size, dtype=np.float64)
    c = size // 2
    return np.exp(-4.0 * np.log(2.0) * (x - c) ** 2 / fwhm ** 2)


def _reflect_matrix(n, pad):
    """(n+2p, n) one-hot matrix implementing 1-D 'reflect' padding."""
    t = np.arange(n + 2 * pad) - pad
    t = np.where(t < 0, -t, t)
    t = np.where(t > n - 1, 2 * (n - 1) - t, t)
    r = np.zeros((n + 2 * pad, n), np.float64)
    r[np.arange(n + 2 * pad), t] = 1.0
    return r


def _conv_matrix(l_out, l_pad, filt):
    """(l_pad, l_out) matrix of the valid cross-correlation: out = padded @ C."""
    k = np.arange(l_pad)[:, None] - np.arange(l_out)[None, :]
    valid = (k >= 0) & (k < filt.shape[0])
    return np.where(valid, filt[np.clip(k, 0, filt.shape[0] - 1)], 0.0)


def _interp_matrix(out_size, in_size):
    """Bilinear align_corners=True interpolation weights, (out_size, in_size)."""
    if out_size == 1:
        src = np.zeros((1,), np.float64)
    else:
        src = np.arange(out_size, dtype=np.float64) * (in_size - 1) / (out_size - 1)
    i0 = np.clip(np.floor(src).astype(np.int64), 0, in_size - 1)
    i1 = np.clip(i0 + 1, 0, in_size - 1)
    frac = src - i0
    mat = np.zeros((out_size, in_size), np.float64)
    mat[np.arange(out_size), i0] += 1.0 - frac
    mat[np.arange(out_size), i1] += frac
    return mat


@functools.lru_cache(maxsize=8)
def _grid_constants(h_out, w_out):
    filt = _make_1d_gaussian(FILT_SIZE, ATTRACTION_FWHM)
    h_g, w_g = GRID_SHAPE

    def fold(n):
        r = _reflect_matrix(n, PADDING)                     # (n+2p, n)
        c = _conv_matrix(n, n + 2 * PADDING, filt)          # (n+2p, n)
        p = (np.arange(n + 2 * PADDING) - PADDING) / (n - 1.0)
        cd = r.T @ c                                        # pad + conv (denominator)
        cn = r.T @ (p[:, None] * c)                         # pad + P-basis + conv
        return cn, cd

    cn_x, cd_x = fold(w_g)                                  # (51, 51) each
    cn_y, cd_y = fold(h_g)                                  # (31, 31) each

    # packed [num | den] blocks, lane-padded to 128 so each branch is 1 matmul
    gcx = np.zeros((w_g, 128), np.float32)
    gcx[:, :w_g] = cn_x
    gcx[:, _DEN_OFF:_DEN_OFF + w_g] = cd_x
    gcy = np.zeros((h_g, 128), np.float32)
    gcy[:, :h_g] = cn_y
    gcy[:, _DEN_OFF:_DEN_OFF + h_g] = cd_y

    # lane-dense shared output / resize padding
    l_pad = max(128, ((max(h_out, w_out) + 127) // 128) * 128)
    interp = np.zeros((_Y_INTERP_ROW + 32, l_pad), np.float32)      # (88, L_pad)
    interp[:w_g, :w_out] = _interp_matrix(w_out, w_g).T             # wxt (51, W_out)
    interp[_Y_INTERP_ROW:_Y_INTERP_ROW + h_g, :h_out] = _interp_matrix(h_out, h_g).T
    return gcx, gcy, interp, l_pad


def _norm01(x):
    """Guarded normalize_image: constant map -> zeros instead of NaN."""
    lo = jnp.min(x)
    rng = jnp.max(x) - lo
    return jnp.where(rng > 0.0, (x - lo) / jnp.maximum(rng, 1e-30),
                     jnp.zeros_like(x))


# ----------------------------------------------------------------------------
# Full forward (MixKDEGrid.forward, fusion_method='add', separable=True)
# ----------------------------------------------------------------------------
@functools.partial(jax.jit, static_argnames=("materialize_batch",))
def mix_kde_grid_forward(imgs, v_pts, gt_bboxes, img_saliency, dataset_saliency,
                         materialize_batch=True):
    # TODO(synk): the CuboidLayerGlobal/TripetLayerGlobal homography layer
    # (self.homo) and the pickled dataset saliency are not available; both
    # saliency maps are supplied directly as (1,1,31,51) inputs, so v_pts is
    # unused here.
    del v_pts
    assert imgs.ndim == 4
    assert img_saliency.shape == dataset_saliency.shape == (1, 1) + GRID_SHAPE

    n = imgs.shape[0]
    h_out = int(imgs.shape[2] * WARP_SCALE)
    w_out = int(imgs.shape[3] * WARP_SCALE)
    h_img, w_img = float(imgs.shape[2]), float(imgs.shape[3])
    h_g, w_g = GRID_SHAPE

    # ---- pack the boxes into one fixed-size tile (and its transpose) -------
    m = int(gt_bboxes.shape[0])
    assert m <= M_MAX, f"at most {M_MAX} boxes supported, got {m}"
    boxes_sub = jnp.zeros((M_MAX, 8), jnp.float32)
    if m > 0:
        gt = gt_bboxes.astype(jnp.float32)
        wh = gt[:, 2:4] - gt[:, 0:2]
        cxy = gt[:, 0:2] + 0.5 * wh
        vals = jnp.concatenate([cxy, wh, jnp.ones((m, 1), jnp.float32)], axis=1)
        boxes_sub = boxes_sub.at[:m, :5].set(vals)          # cx, cy, w, h, mask
    boxes_lane = boxes_sub.T                                # (8, M_MAX)

    # ---- external (img + dataset) saliency: constant maps, so normalize and
    #      reduce them in XLA instead of inside the kernel --------------------
    ext2d = (BETA * _norm01(img_saliency[0, 0].astype(jnp.float32))
             + GAMMA * _norm01(dataset_saliency[0, 0].astype(jnp.float32)))
    ext_xy = jnp.zeros((2, 64), jnp.float32)
    ext_xy = ext_xy.at[0, :w_g].set(jnp.sum(ext2d, axis=0))   # sum over y -> (51,)
    ext_xy = ext_xy.at[1, :h_g].set(jnp.sum(ext2d, axis=1))   # sum over x -> (31,)

    # per-box "+1/61^2" summed over valid boxes; uniform map if no boxes.
    # Passed as a runtime value so the kernel never recompiles per box count.
    const_add = (m / float(FILT_SIZE ** 2)) if m > 0 else 1.0 / float(h_g * w_g)
    params = jnp.array([[const_add, ALPHA, AMPLITUDE_SCALE, 0.0]], jnp.float32)

    gcx, gcy, interp, l_pad = _grid_constants(h_out, w_out)

    kernel = functools.partial(_mix_kde_grid_kernel, h_img=h_img, w_img=w_img)

    out = pl.pallas_call(
        kernel,
        out_shape=jax.ShapeDtypeStruct((2, l_pad), jnp.float32),
        in_specs=[pl.BlockSpec(memory_space=VMEM)] * 7,
        out_specs=pl.BlockSpec(memory_space=VMEM),
    )(boxes_sub, boxes_lane, ext_xy,
      jnp.asarray(gcx), jnp.asarray(gcy), jnp.asarray(interp), params)

    xg = out[0, :w_out]                                    # (W_out,)
    yg = out[1, :h_out]                                    # (H_out,)

    # x varies only along W, y only along H, and the grid is identical for
    # every image: pure broadcasting past the kernel.
    grid = jnp.stack([jnp.broadcast_to(xg[None, :], (h_out, w_out)),
                      jnp.broadcast_to(yg[:, None], (h_out, w_out))], axis=-1)
    grid = grid[None]                                      # (1, H, W, 2)
    if materialize_batch:
        # Module-faithful (N, H, W, 2) output. At production sizes this N-way
        # copy of identical data dominates end-to-end cost; downstream
        # consumers should pass materialize_batch=False and broadcast lazily.
        grid = jnp.broadcast_to(grid, (n, h_out, w_out, 2))
    return grid


# ----------------------------------------------------------------------------
if __name__ == "__main__":
    key = jax.random.PRNGKey(0)
    k1, k2, k3, k4 = jax.random.split(key, 4)

    N, C, H, W = 2, 4, 16, 16
    imgs = jax.random.normal(k1, (N, C, H, W), jnp.float32)
    v_pts = jnp.array([8.0, 8.0], jnp.float32)

    # 5 ground-truth boxes in xyxy format inside the 16x16 image.
    xy1 = jax.random.uniform(k2, (5, 2), minval=0.0, maxval=8.0)
    wh = jax.random.uniform(k3, (5, 2), minval=2.0, maxval=7.0)
    gt_bboxes = jnp.concatenate([xy1, xy1 + wh], axis=1).astype(jnp.float32)

    # Deterministic synthetic stand-ins for the homography-layer saliency and
    # the pickled dataset saliency (both (1, 1, 31, 51)).
    yy = jnp.arange(GRID_SHAPE[0], dtype=jnp.float32)[:, None]
    xx = jnp.arange(GRID_SHAPE[1], dtype=jnp.float32)[None, :]
    img_saliency = jnp.exp(
        -4.0 * np.log(2.0) * ((xx - 25.0) ** 2 + (yy - 15.0) ** 2) / 10.0 ** 2
    )[None, None]
    dataset_saliency = (0.25 + 0.5 * jax.random.uniform(
        k4, (1, 1) + GRID_SHAPE, jnp.float32))

    grid = mix_kde_grid_forward(imgs, v_pts, gt_bboxes, img_saliency,
                                dataset_saliency)
    grid = jax.block_until_ready(grid)

    assert grid.shape == (N, H, W, 2), grid.shape
    assert not bool(jnp.isnan(grid).any())
    assert bool((jnp.abs(grid) <= 1.0 + 1e-5).all())
    print("KERNEL_OK")
</pallas_src>

<mosaic_0001>
module attributes {stable_mosaic.version = 11 : i64} {
  func.func @_mix_kde_grid_kernel(%arg0: memref<64x8xf32, #tpu.memory_space<vmem>>, %arg1: memref<8x64xf32, #tpu.memory_space<vmem>>, %arg2: memref<2x64xf32, #tpu.memory_space<vmem>>, %arg3: memref<51x128xf32, #tpu.memory_space<vmem>>, %arg4: memref<31x128xf32, #tpu.memory_space<vmem>>, %arg5: memref<88x128xf32, #tpu.memory_space<vmem>>, %arg6: memref<1x4xf32, #tpu.memory_space<vmem>>, %arg7: memref<2x128xf32, #tpu.memory_space<vmem>>) attributes {dimension_semantics = [], scalar_prefetch = 0 : i64, scratch_operands = 0 : i64, tpu.core_type = #tpu.core_type<tc>} {
    %c0 = arith.constant 0 : index
    %c0_0 = arith.constant 0 : index
    %0 = vector.load %arg6[%c0, %c0_0] : memref<1x4xf32, #tpu.memory_space<vmem>>, vector<1x4xf32>
    %1 = vector.extract_strided_slice %0 {offsets = [0, 0], sizes = [1, 1], strides = [1, 1]} : vector<1x4xf32> to vector<1x1xf32>
    %2 = vector.extract_strided_slice %0 {offsets = [0, 1], sizes = [1, 1], strides = [1, 1]} : vector<1x4xf32> to vector<1x1xf32>
    %3 = vector.extract_strided_slice %0 {offsets = [0, 2], sizes = [1, 1], strides = [1, 1]} : vector<1x4xf32> to vector<1x1xf32>
    %c0_1 = arith.constant 0 : index
    %c0_2 = arith.constant 0 : index
    %4 = vector.load %arg0[%c0_1, %c0_2] : memref<64x8xf32, #tpu.memory_space<vmem>>, vector<64x8xf32>
    %5 = vector.extract_strided_slice %4 {offsets = [0, 0], sizes = [64, 1], strides = [1, 1]} : vector<64x8xf32> to vector<64x1xf32>
    %6 = vector.extract_strided_slice %4 {offsets = [0, 1], sizes = [64, 1], strides = [1, 1]} : vector<64x8xf32> to vector<64x1xf32>
    %7 = vector.extract_strided_slice %4 {offsets = [0, 2], sizes = [64, 1], strides = [1, 1]} : vector<64x8xf32> to vector<64x1xf32>
    %8 = vector.extract_strided_slice %4 {offsets = [0, 3], sizes = [64, 1], strides = [1, 1]} : vector<64x8xf32> to vector<64x1xf32>
    %9 = vector.extract_strided_slice %4 {offsets = [0, 4], sizes = [64, 1], strides = [1, 1]} : vector<64x8xf32> to vector<64x1xf32>
    %c0_3 = arith.constant 0 : index
    %c0_4 = arith.constant 0 : index
    %10 = vector.load %arg1[%c0_3, %c0_4] : memref<8x64xf32, #tpu.memory_space<vmem>>, vector<8x64xf32>
    %11 = vector.extract_strided_slice %10 {offsets = [1, 0], sizes = [1, 64], strides = [1, 1]} : vector<8x64xf32> to vector<1x64xf32>
    %12 = vector.extract_strided_slice %10 {offsets = [3, 0], sizes = [1, 64], strides = [1, 1]} : vector<8x64xf32> to vector<1x64xf32>
    %cst = arith.constant 6.400000e+01 : f32
    %13 = vector.broadcast %cst : f32 to vector<64x1xf32>
    %14 = arith.mulf %7, %13 : vector<64x1xf32>
    %cst_5 = arith.constant 1.000000e+00 : f32
    %15 = vector.broadcast %cst_5 : f32 to vector<64x1xf32>
    %16 = arith.maximumf %14, %15 : vector<64x1xf32>
    %17 = tpu.reciprocal %16 {approx = true} : vector<64x1xf32> -> vector<64x1xf32>
    %cst_6 = arith.constant 6.400000e+01 : f32
    %18 = vector.broadcast %cst_6 : f32 to vector<64x1xf32>
    %19 = arith.mulf %8, %18 : vector<64x1xf32>
    %cst_7 = arith.constant 1.000000e+00 : f32
    %20 = vector.broadcast %cst_7 : f32 to vector<64x1xf32>
    %21 = arith.maximumf %19, %20 : vector<64x1xf32>
    %22 = tpu.reciprocal %21 {approx = true} : vector<64x1xf32> -> vector<64x1xf32>
    %cst_8 = arith.constant 6.400000e+01 : f32
    %23 = vector.broadcast %cst_8 : f32 to vector<1x64xf32>
    %24 = arith.mulf %12, %23 : vector<1x64xf32>
    %cst_9 = arith.constant 1.000000e+00 : f32
    %25 = vector.broadcast %cst_9 : f32 to vector<1x64xf32>
    %26 = arith.maximumf %24, %25 : vector<1x64xf32>
    %27 = tpu.reciprocal %26 {approx = true} : vector<1x64xf32> -> vector<1x64xf32>
    %28 = tpu.iota {dimensions = array<i32: 1>} : vector<1x51xi32>
    %29 = arith.sitofp %28 : vector<1x51xi32> to vector<1x51xf32>
    %cst_10 = arith.constant 3.200000e-01 : f32
    %30 = vector.broadcast %cst_10 : f32 to vector<1x51xf32>
    %31 = arith.mulf %29, %30 : vector<1x51xf32>
    %32 = tpu.iota {dimensions = array<i32: 1>} : vector<1x31xi32>
    %33 = arith.sitofp %32 : vector<1x31xi32> to vector<1x31xf32>
    %cst_11 = arith.constant 0.533333361 : f32
    %34 = vector.broadcast %cst_11 : f32 to vector<1x31xf32>
    %35 = arith.mulf %33, %34 : vector<1x31xf32>
    %36 = tpu.iota {dimensions = array<i32: 0>} : vector<31x1xi32>
    %37 = arith.sitofp %36 : vector<31x1xi32> to vector<31x1xf32>
    %cst_12 = arith.constant 0.533333361 : f32
    %38 = vector.broadcast %cst_12 : f32 to vector<31x1xf32>
    %39 = arith.mulf %37, %38 : vector<31x1xf32>
    %40 = vector.broadcast %31 : vector<1x51xf32> to vector<64x51xf32>
    %41 = vector.broadcast %5 : vector<64x1xf32> to vector<64x51xf32>
    %42 = arith.subf %40, %41 : vector<64x51xf32>
    %cst_13 = arith.constant -5.000000e-01 : f32
    %43 = vector.broadcast %cst_13 : f32 to vector<64x51xf32>
    %44 = arith.mulf %43, %42 : vector<64x51xf32>
    %45 = arith.mulf %44, %42 : vector<64x51xf32>
    %46 = vector.broadcast %17 : vector<64x1xf32> to vector<64x51xf32>
    %47 = arith.mulf %45, %46 : vector<64x51xf32>
    %48 = math.exp %47 : vector<64x51xf32>
    %49 = vector.broadcast %35 : vector<1x31xf32> to vector<64x31xf32>
    %50 = vector.broadcast %6 : vector<64x1xf32> to vector<64x31xf32>
    %51 = arith.subf %49, %50 : vector<64x31xf32>
    %cst_14 = arith.constant -5.000000e-01 : f32
    %52 = vector.broadcast %cst_14 : f32 to vector<64x31xf32>
    %53 = arith.mulf %52, %51 : vector<64x31xf32>
    %54 = arith.mulf %53, %51 : vector<64x31xf32>
    %55 = vector.broadcast %22 : vector<64x1xf32> to vector<64x31xf32>
    %56 = arith.mulf %54, %55 : vector<64x31xf32>
    %57 = math.exp %56 : vector<64x31xf32>
    %58 = vector.broadcast %39 : vector<31x1xf32> to vector<31x64xf32>
    %59 = vector.broadcast %11 : vector<1x64xf32> to vector<31x64xf32>
    %60 = arith.subf %58, %59 : vector<31x64xf32>
    %cst_15 = arith.constant -5.000000e-01 : f32
    %61 = vector.broadcast %cst_15 : f32 to vector<31x64xf32>
    %62 = arith.mulf %61, %60 : vector<31x64xf32>
    %63 = arith.mulf %62, %60 : vector<31x64xf32>
    %64 = vector.broadcast %27 : vector<1x64xf32> to vector<31x64xf32>
    %65 = arith.mulf %63, %64 : vector<31x64xf32>
    %66 = math.exp %65 : vector<31x64xf32>
    %cst_16 = arith.constant dense<0.000000e+00> : vector<64xf32>
    %67 = vector.multi_reduction <add>, %48, %cst_16 [1] : vector<64x51xf32> to vector<64xf32>
    %68 = vector.shape_cast %67 : vector<64xf32> to vector<64x1xf32>
    %cst_17 = arith.constant dense<0.000000e+00> : vector<64xf32>
    %69 = vector.multi_reduction <add>, %57, %cst_17 [1] : vector<64x31xf32> to vector<64xf32>
    %70 = vector.shape_cast %69 : vector<64xf32> to vector<64x1xf32>
    %71 = vector.broadcast %3 : vector<1x1xf32> to vector<64x1xf32>
    %72 = arith.mulf %71, %9 : vector<64x1xf32>
    %73 = arith.mulf %68, %70 : vector<64x1xf32>
    %cst_18 = arith.constant 9.99999974E-6 : f32
    %74 = vector.broadcast %cst_18 : f32 to vector<64x1xf32>
    %75 = arith.addf %74, %73 : vector<64x1xf32>
    %76 = tpu.reciprocal %75 {approx = true} : vector<64x1xf32> -> vector<64x1xf32>
    %77 = arith.mulf %72, %76 : vector<64x1xf32>
    %78 = vector.broadcast %77 : vector<64x1xf32> to vector<64x51xf32>
    %79 = arith.mulf %48, %78 : vector<64x51xf32>
    %cst_19 = arith.constant dense<0.000000e+00> : vector<31x51xf32>
    %80 = tpu.matmul %66, %79, %cst_19 {dimension_numbers = #tpu.dot_dimension_numbers<[1], [0], [0], [1], [0, 0, 1, 1], [], []>} : vector<31x64xf32>, vector<64x51xf32>, vector<31x51xf32> -> vector<31x51xf32>
    %81 = vector.broadcast %1 : vector<1x1xf32> to vector<31x51xf32>
    %82 = arith.addf %80, %81 : vector<31x51xf32>
    %83 = vector.shape_cast %82 : vector<31x51xf32> to vector<1x31x51xf32>
    %cst_20 = arith.constant dense<0x7F800000> : vector<1xf32>
    %84 = vector.multi_reduction <minimumf>, %83, %cst_20 [1, 2] : vector<1x31x51xf32> to vector<1xf32>
    %85 = vector.shape_cast %84 : vector<1xf32> to vector<1x1x1xf32>
    %86 = vector.extract %85[0, 0, 0] : f32 from vector<1x1x1xf32>
    %87 = vector.broadcast %86 : f32 to vector<1x1xf32>
    %88 = vector.shape_cast %82 : vector<31x51xf32> to vector<1x31x51xf32>
    %cst_21 = arith.constant dense<0xFF800000> : vector<1xf32>
    %89 = vector.multi_reduction <maximumf>, %88, %cst_21 [1, 2] : vector<1x31x51xf32> to vector<1xf32>
    %90 = vector.shape_cast %89 : vector<1xf32> to vector<1x1x1xf32>
    %91 = vector.extract %90[0, 0, 0] : f32 from vector<1x1x1xf32>
    %92 = vector.broadcast %91 : f32 to vector<1x1xf32>
    %93 = arith.subf %92, %87 : vector<1x1xf32>
    %cst_22 = arith.constant 0.000000e+00 : f32
    %94 = vector.broadcast %cst_22 : f32 to vector<1x1xf32>
    %95 = arith.cmpf ogt, %93, %94 : vector<1x1xf32>
    %cst_23 = arith.constant 1.000000e-30 : f32
    %96 = vector.broadcast %cst_23 : f32 to vector<1x1xf32>
    %97 = arith.maximumf %93, %96 : vector<1x1xf32>
    %98 = tpu.reciprocal %97 {approx = true} : vector<1x1xf32> -> vector<1x1xf32>
    %cst_24 = arith.constant 0.000000e+00 : f32
    %99 = vector.broadcast %cst_24 : f32 to vector<1x1xf32>
    %100 = arith.select %95, %98, %99 : vector<1x1xi1>, vector<1x1xf32>
    %101 = vector.broadcast %87 : vector<1x1xf32> to vector<31x51xf32>
    %102 = arith.subf %82, %101 : vector<31x51xf32>
    %103 = vector.broadcast %100 : vector<1x1xf32> to vector<31x51xf32>
    %104 = arith.mulf %102, %103 : vector<31x51xf32>
    %c0_25 = arith.constant 0 : index
    %c0_26 = arith.constant 0 : index
    %105 = vector.load %arg2[%c0_25, %c0_26] : memref<2x64xf32, #tpu.memory_space<vmem>>, vector<1x51xf32>
    %c1 = arith.constant 1 : index
    %c0_27 = arith.constant 0 : index
    %106 = vector.load %arg2[%c1, %c0_27] : memref<2x64xf32, #tpu.memory_space<vmem>>, vector<1x31xf32>
    %cst_28 = arith.constant dense<0.000000e+00> : vector<51xf32>
    %107 = vector.multi_reduction <add>, %104, %cst_28 [0] : vector<31x51xf32> to vector<51xf32>
    %108 = vector.shape_cast %107 : vector<51xf32> to vector<1x51xf32>
    %109 = vector.broadcast %2 : vector<1x1xf32> to vector<1x51xf32>
    %110 = arith.mulf %109, %108 : vector<1x51xf32>
    %111 = arith.addf %110, %105 : vector<1x51xf32>
    %cst_29 = arith.constant dense<0.000000e+00> : vector<31xf32>
    %112 = vector.multi_reduction <add>, %104, %cst_29 [1] : vector<31x51xf32> to vector<31xf32>
    %113 = vector.shape_cast %112 : vector<31xf32> to vector<31x1xf32>
    %114 = vector.broadcast %2 : vector<1x1xf32> to vector<31x1xf32>
    %115 = arith.mulf %114, %113 : vector<31x1xf32>
    %116 = tpu.iota {dimensions = array<i32: 0>} : vector<31x31xi32>
    %117 = tpu.iota {dimensions = array<i32: 1>} : vector<31x31xi32>
    %118 = arith.cmpi eq, %116, %117 : vector<31x31xi32>
    %119 = arith.extui %118 : vector<31x31xi1> to vector<31x31xi32>
    %120 = arith.sitofp %119 : vector<31x31xi32> to vector<31x31xf32>
    %121 = vector.broadcast %115 : vector<31x1xf32> to vector<31x31xf32>
    %122 = arith.mulf %120, %121 : vector<31x31xf32>
    %cst_30 = arith.constant dense<0.000000e+00> : vector<31xf32>
    %123 = vector.multi_reduction <add>, %122, %cst_30 [0] : vector<31x31xf32> to vector<31xf32>
    %124 = vector.shape_cast %123 : vector<31xf32> to vector<1x31xf32>
    %125 = arith.addf %124, %106 : vector<1x31xf32>
    %c0_31 = arith.constant 0 : index
    %c0_32 = arith.constant 0 : index
    %126 = vector.load %arg3[%c0_31, %c0_32] : memref<51x128xf32, #tpu.memory_space<vmem>>, vector<51x128xf32>
    %c0_33 = arith.constant 0 : index
    %c0_34 = arith.constant 0 : index
    %127 = vector.load %arg5[%c0_33, %c0_34] : memref<88x128xf32, #tpu.memory_space<vmem>>, vector<51x128xf32>
    %cst_35 = arith.constant dense<0.000000e+00> : vector<1x128xf32>
    %128 = tpu.matmul %111, %126, %cst_35 {dimension_numbers = #tpu.dot_dimension_numbers<[1], [0], [0], [1], [0, 0, 1, 1], [], []>} : vector<1x51xf32>, vector<51x128xf32>, vector<1x128xf32> -> vector<1x128xf32>
    %129 = vector.extract_strided_slice %128 {offsets = [0, 0], sizes = [1, 51], strides = [1, 1]} : vector<1x128xf32> to vector<1x51xf32>
    %130 = vector.extract_strided_slice %128 {offsets = [0, 64], sizes = [1, 51], strides = [1, 1]} : vector<1x128xf32> to vector<1x51xf32>
    %cst_36 = arith.constant 0.000000e+00 : f32
    %131 = vector.broadcast %cst_36 : f32 to vector<1x51xf32>
    %132 = arith.cmpf ogt, %130, %131 : vector<1x51xf32>
    %cst_37 = arith.constant 0.000000e+00 : f32
    %133 = vector.broadcast %cst_37 : f32 to vector<1x51xf32>
    %134 = arith.cmpf ogt, %130, %133 : vector<1x51xf32>
    %cst_38 = arith.constant 1.000000e+00 : f32
    %135 = vector.broadcast %cst_38 : f32 to vector<1x51xf32>
    %136 = arith.select %134, %130, %135 : vector<1x51xi1>, vector<1x51xf32>
    %137 = tpu.reciprocal %136 {approx = true} : vector<1x51xf32> -> vector<1x51xf32>
    %cst_39 = arith.constant 0.000000e+00 : f32
    %138 = vector.broadcast %cst_39 : f32 to vector<1x51xf32>
    %139 = arith.select %132, %137, %138 : vector<1x51xi1>, vector<1x51xf32>
    %140 = arith.mulf %129, %139 : vector<1x51xf32>
    %cst_40 = arith.constant 2.000000e+00 : f32
    %141 = vector.broadcast %cst_40 : f32 to vector<1x51xf32>
    %142 = arith.mulf %140, %141 : vector<1x51xf32>
    %cst_41 = arith.constant 1.000000e+00 : f32
    %143 = vector.broadcast %cst_41 : f32 to vector<1x51xf32>
    %144 = arith.subf %142, %143 : vector<1x51xf32>
    %cst_42 = arith.constant -1.000000e+00 : f32
    %cst_43 = arith.constant 1.000000e+00 : f32
    %145 = vector.broadcast %cst_42 : f32 to vector<1x51xf32>
    %146 = arith.maximumf %145, %144 : vector<1x51xf32>
    %147 = vector.broadcast %cst_43 : f32 to vector<1x51xf32>
    %148 = arith.minimumf %147, %146 : vector<1x51xf32>
    %cst_44 = arith.constant dense<0.000000e+00> : vector<1x128xf32>
    %149 = tpu.matmul %148, %127, %cst_44 {dimension_numbers = #tpu.dot_dimension_numbers<[1], [0], [0], [1], [0, 0, 1, 1], [], []>} : vector<1x51xf32>, vector<51x128xf32>, vector<1x128xf32> -> vector<1x128xf32>
    %c0_45 = arith.constant 0 : index
    %c0_46 = arith.constant 0 : index
    %150 = vector.load %arg7[%c0_45, %c0_46] : memref<2x128xf32, #tpu.memory_space<vmem>>, vector<1x128xf32>
    tpu.vector_store %arg7[%c0_45, %c0_46], %149 {strides = array<i32>} : memref<2x128xf32, #tpu.memory_space<vmem>>, vector<1x128xf32>,
    %c0_47 = arith.constant 0 : index
    %c0_48 = arith.constant 0 : index
    %151 = vector.load %arg4[%c0_47, %c0_48] : memref<31x128xf32, #tpu.memory_space<vmem>>, vector<31x128xf32>
    %c56 = arith.constant 56 : index
    %c0_49 = arith.constant 0 : index
    %152 = vector.load %arg5[%c56, %c0_49] : memref<88x128xf32, #tpu.memory_space<vmem>>, vector<31x128xf32>
    %cst_50 = arith.constant dense<0.000000e+00> : vector<1x128xf32>
    %153 = tpu.matmul %125, %151, %cst_50 {dimension_numbers = #tpu.dot_dimension_numbers<[1], [0], [0], [1], [0, 0, 1, 1], [], []>} : vector<1x31xf32>, vector<31x128xf32>, vector<1x128xf32> -> vector<1x128xf32>
    %154 = vector.extract_strided_slice %153 {offsets = [0, 0], sizes = [1, 31], strides = [1, 1]} : vector<1x128xf32> to vector<1x31xf32>
    %155 = vector.extract_strided_slice %153 {offsets = [0, 64], sizes = [1, 31], strides = [1, 1]} : vector<1x128xf32> to vector<1x31xf32>
    %cst_51 = arith.constant 0.000000e+00 : f32
    %156 = vector.broadcast %cst_51 : f32 to vector<1x31xf32>
    %157 = arith.cmpf ogt, %155, %156 : vector<1x31xf32>
    %cst_52 = arith.constant 0.000000e+00 : f32
    %158 = vector.broadcast %cst_52 : f32 to vector<1x31xf32>
    %159 = arith.cmpf ogt, %155, %158 : vector<1x31xf32>
    %cst_53 = arith.constant 1.000000e+00 : f32
    %160 = vector.broadcast %cst_53 : f32 to vector<1x31xf32>
    %161 = arith.select %159, %155, %160 : vector<1x31xi1>, vector<1x31xf32>
    %162 = tpu.reciprocal %161 {approx = true} : vector<1x31xf32> -> vector<1x31xf32>
    %cst_54 = arith.constant 0.000000e+00 : f32
    %163 = vector.broadcast %cst_54 : f32 to vector<1x31xf32>
    %164 = arith.select %157, %162, %163 : vector<1x31xi1>, vector<1x31xf32>
    %165 = arith.mulf %154, %164 : vector<1x31xf32>
    %cst_55 = arith.constant 2.000000e+00 : f32
    %166 = vector.broadcast %cst_55 : f32 to vector<1x31xf32>
    %167 = arith.mulf %165, %166 : vector<1x31xf32>
    %cst_56 = arith.constant 1.000000e+00 : f32
    %168 = vector.broadcast %cst_56 : f32 to vector<1x31xf32>
    %169 = arith.subf %167, %168 : vector<1x31xf32>
    %cst_57 = arith.constant -1.000000e+00 : f32
    %cst_58 = arith.constant 1.000000e+00 : f32
    %170 = vector.broadcast %cst_57 : f32 to vector<1x31xf32>
    %171 = arith.maximumf %170, %169 : vector<1x31xf32>
    %172 = vector.broadcast %cst_58 : f32 to vector<1x31xf32>
    %173 = arith.minimumf %172, %171 : vector<1x31xf32>
    %cst_59 = arith.constant dense<0.000000e+00> : vector<1x128xf32>
    %174 = tpu.matmul %173, %152, %cst_59 {dimension_numbers = #tpu.dot_dimension_numbers<[1], [0], [0], [1], [0, 0, 1, 1], [], []>} : vector<1x31xf32>, vector<31x128xf32>, vector<1x128xf32> -> vector<1x128xf32>
    %c1_60 = arith.constant 1 : index
    %c0_61 = arith.constant 0 : index
    %175 = vector.load %arg7[%c1_60, %c0_61] : memref<2x128xf32, #tpu.memory_space<vmem>>, vector<1x128xf32>
    tpu.vector_store %arg7[%c1_60, %c0_61], %174 {strides = array<i32>} : memref<2x128xf32, #tpu.memory_space<vmem>>, vector<1x128xf32>,
    return
  }
}

</mosaic_0001>

<bundles_post_ra>
// kernel: mix_kde_grid_forward.1
= control target key start
LH: loop header
LB: loop body
LE: loop exit
PB: predicated region body
PF: predicated region fallthrough
CT: control target
= control target key end

     0   :  { %v1421_v0 = vmov 1   ;;  %v1422_v9 = vmov 0   ;;  %v1423_v16 = vmov 2   ;;  %v1424_v20 = vmov 3   ;;  %s1430_s16 = smov 64   ;;  %s1841_s0 = inlined_call_operand.vmem [shape: f32[64,8], index: 0, kind: input, shape index: {}]   ;;  %s1842_s6 = inlined_call_operand.vmem [shape: f32[1,4], index: 6, kind: input, shape index: {}]   ;;  %s1843_s1 = inlined_call_operand.vmem [shape: f32[8,64], index: 1, kind: input, shape index: {}]   ;;  %s1844_s3 = inlined_call_operand.vmem [shape: f32[51,128], index: 3, kind: input, shape index: {}]   ;;  %s1845_s4 = inlined_call_operand.vmem [shape: f32[31,128], index: 4, kind: input, shape index: {}]   ;;  %s1846_s2 = inlined_call_operand.vmem [shape: f32[2,64], index: 2, kind: input, shape index: {}]   ;;  %s1847_s5 = inlined_call_operand.vmem [shape: f32[88,128], index: 5, kind: input, shape index: {}]   ;;  %s1848_s7 = inlined_call_operand.vmem [shape: f32[2,128], index: 7, kind: output, shape index: {}]  }
   0x1   :  { %1319 = vset.pattern.permute.xlu0 %v1421_v0  ;;  %1317 = vset.pattern.permute.xlu1 %v1421_v0  ;;  %v1476_v1 = vld [vmem:[%s1841_s0 + $0x10] sm:$0xff]  ;;  %v1481_v2 = vld [vmem:[%s1841_s0] sm:$0xff]  ;;  %v1489_v4 = vld [vmem:[%s1841_s0 + $0x28] sm:$0xff]  ;;  %v63_v36 = vlaneseq  ;;  %vm353_vm0 = vcmask 416768   ;;  %vm378_vm1 = vcmask 252928   ;;  %vm525_vm2 = vcmask 523264  }
   0x2   :  { %218 = vperm.xlu0 %1319, %v1476_v1   ;;  %210 = vperm.xlu1 %1317, %v1481_v2   ;;  %v36_v3 = vmul.f32 64.0, %v1481_v2  ;;  %v1494_v5 = vld [vmem:[%s1841_s0 + $0x8] sm:$0xff]  ;;  %v1501_v7 = vld [vmem:[%s1841_s0 + $0x18] sm:$0xff]  ;;  %v1511_v10 = vld [vmem:[%s1841_s0 + $0x20] sm:$0xff]  ;;  %v38_v15 = vmul.f32 64.0, %v1476_v1  ;;  %v41_v18 = vmul.f32 64.0, %v1489_v4 }
   0x3   :  { %v37_v8 = vmul.f32 64.0, %v1494_v5  ;;  %v40_v12 = vmul.f32 64.0, %v1511_v10  ;;  %v1525_v19 = vld [vmem:[%s1841_s0 + $0x38] sm:$0xff]  ;;  %v1530_v21 = vld [vmem:[%s1841_s0 + $0x30] sm:$0xff]  ;;  %v39_v23 = vmul.f32 64.0, %v1501_v7  ;;  %s1425_s0 = smov 126  }
   0x4   :  { %v44_v6 = vmax.f32 %v36_v3, 1.0  ;;  %v46_v17 = vmax.f32 %v38_v15, 1.0  ;;  %v49_v24 = vmax.f32 %v41_v18, 1.0  ;;  %v42_v25 = vmul.f32 64.0, %v1530_v21 }
   0x5   :  { %v45_v11 = vmax.f32 %v37_v8, 1.0  ;;  %v48_v14 = vmax.f32 %v40_v12, 1.0  ;;  %v47_v26 = vmax.f32 %v39_v23, 1.0  ;;  %v43_v33 = vmul.f32 64.0, %v1525_v19 }
   0x6   :  { %230 = vperm.xlu0 %1319, %v1489_v4   ;;  %214 = vperm.xlu1 %1317, %v1494_v5   ;;  %1341 = vrcp.f32 %v44_v6  ;;  %v50_v27 = vmax.f32 %v42_v25, 1.0  ;;  %v1560_v39 = vand.u32 127, %v63_v36  ;;  %vm626_vm3 = vcmask 415744  }
   0x7   :  { %1343 = vrcp.f32 %v45_v11  ;;  %v51_v34 = vmax.f32 %v43_v33, 1.0  ;;  %vm776_vm5 = vcmask 1042432   ;;  %vm1428_vm6 = vmmov 0  }
   0x8   :  { %1345 = vrcp.f32 %v48_v14  ;;  %v65_v42 = vcvt.s32.f32 %v1560_v39  ;;  %vm951_vm7 = vcmask 1046528   ;;  %vm1429_vm8 = vmmov 1  }
   0x9   :  { %1347 = vrcp.f32 %v46_v17  ;;  %vm1755_vm9 = vmpackc.low %vm951_vm7, %vm1429_vm8  ;;  %vm749_vm14 = vcmask 251904  }
   0xa   :  { %1325 = vset.pattern.permute.xlu0 %v1422_v9  ;;  %1318 = vset.pattern.permute.xlu1 %v1422_v9  ;;  %1349 = vrcp.f32 %v49_v24  ;;  %v1565_v43 = vmul.f32 0.32, %v65_v42  ;;  %v1568_v47 = vmul.f32 0.53333336, %v65_v42 }
   0xb   :  { %83 = vperm.xlu0 %1325, %v1481_v2   ;;  %98 = vperm.xlu1 %1318, %v1501_v7   ;;  %1351 = vrcp.f32 %v47_v26 }
   0xc   :  { %1353 = vrcp.f32 %v50_v27 }
   0xd   :  { %1355 = vrcp.f32 %v51_v34 }
   0xf   :  { %88 = vperm.xlu0 %1325, %v1494_v5   ;;  %1320 = vset.pattern.permute.xlu1 %v1421_v0 }
  0x10   :  { %222 = vperm.xlu1 %1320, %v1501_v7   ;;  %v1342_v13 = vpop.eup %1341 }
  0x11   :  { %v1344_v22 = vpop.eup %1343 }
  0x12   :  { %v1346_v28 = vpop.eup %1345 }
  0x13   :  { %93 = vperm.xlu0 %1325, %v1476_v1   ;;  %v1348_v29 = vpop.eup %1347 }
  0x14   :  { %1321 = vset.pattern.permute.xlu1 %v1423_v16  ;;  %v1350_v30 = vpop.eup %1349 }
  0x15   :  { %147 = vperm.xlu1 %1321, %v1342_v13   ;;  %v1352_v31 = vpop.eup %1351 }
  0x16   :  { %v1354_v32 = vpop.eup %1353 }
  0x17   :  { %103 = vperm.xlu0 %1325, %v1511_v10   ;;  %v1356_v35 = vpop.eup %1355 }
  0x19   :  { %1322 = vset.pattern.permute.xlu1 %v1424_v20 }
  0x1a   :  { %266 = vperm.xlu1 %1322, %v1342_v13  }
  0x1b   :  { %118 = vperm.xlu0 %1325, %v1525_v19  }
  0x1e   :  { %270 = vperm.xlu1 %1322, %v1344_v22  }
  0x1f   :  { %1329 = vset.pattern.permute.xlu0 %v1423_v16 }
  0x20   :  { %152 = vperm.xlu0 %1329, %v1344_v22  }
  0x22   :  { %1323 = vset.pattern.permute.xlu1 %v1422_v9 }
  0x23   :  { %108 = vperm.xlu1 %1323, %v1489_v4  }
  0x24   :  { %167 = vperm.xlu0 %1329, %v1346_v28  }
  0x27   :  { %1324 = vset.pattern.permute.xlu1 %v1421_v0 }
  0x28   :  { %1331 = vset.pattern.permute.xlu0 %v1424_v20  ;;  %226 = vperm.xlu1 %1324, %v1511_v10  }
  0x29   :  { %274 = vperm.xlu0 %1331, %v1348_v29  }
  0x2c   :  { %1326 = vset.pattern.permute.xlu1 %v1423_v16 }
  0x2d   :  { %286 = vperm.xlu0 %1331, %v1350_v30   ;;  %157 = vperm.xlu1 %1326, %v1348_v29  }
  0x31   :  { %162 = vperm.xlu1 %1326, %v1352_v31   ;;  %290 = vperm.xlu0 %1331, %v1354_v32  }
  0x35   :  { %1327 = vset.pattern.permute.xlu1 %v1424_v20  ;;  %411 = vrot.lane.b32.xlu0 %v1494_v5, %s1425_s0 }
  0x36   :  { %278 = vperm.xlu1 %1327, %v1352_v31   ;;  %1336 = vset.pattern.permute.xlu0 %v1423_v16 }
  0x3a   :  { %1328 = vset.pattern.permute.xlu1 %v1422_v9 }
  0x3b   :  { %113 = vperm.xlu1 %1328, %v1530_v21  }
  0x3f   :  { %1330 = vset.pattern.permute.xlu1 %v1421_v0 }
  0x40   :  { %234 = vperm.xlu1 %1330, %v1530_v21  }
  0x44   :  { %238 = vperm.xlu1 %1330, %v1525_v19  }
  0x48   :  { %1332 = vset.pattern.permute.xlu1 %v1423_v16 }
  0x49   :  { %172 = vperm.xlu1 %1332, %v1350_v30  }
  0x4d   :  { %1333 = vset.pattern.permute.xlu1 %v1424_v20 }
  0x4e   :  { %282 = vperm.xlu1 %1333, %v1346_v28  }
  0x52   :  { %1334 = vset.pattern.permute.xlu1 %v1423_v16 }
  0x53   :  { %177 = vperm.xlu1 %1334, %v1354_v32  }
  0x57   :  { %182 = vperm.xlu1 %1334, %v1356_v35  }
  0x5b   :  { %1335 = vset.pattern.permute.xlu1 %v1424_v20 }
  0x5c   :  { %294 = vperm.xlu1 %1335, %v1356_v35  }
  0x60   :  { %409 = vrot.lane.b32.xlu1 %v1481_v2, %s1425_s0 }
  0x61   :  { %1337 = vset.pattern.permute.xlu1 %v1423_v16 }
  0x64   :  { %413 = vrot.lane.b32.xlu1 %v1476_v1, %s1425_s0 }
  0x68   :  { %415 = vrot.lane.b32.xlu1 %v1501_v7, %s1425_s0 }
  0x81   :  { %v211_v37 = vpop.permute.xlu1 %210  ;;  %v219_v38 = vpop.permute.xlu0 %218 }
  0x82   :  { %v241_v51 = vsub.f32 %v1568_v47, %v211_v37  ;;  %v243_v13 = vsub.f32 %v1568_v47, %v219_v38 }
  0x84   :  { %v249_v54 = vmul.f32 -0.5, %v241_v51  ;;  %v251_v23 = vmul.f32 -0.5, %v243_v13 }
  0x85   :  { %v215_v40 = vpop.permute.xlu1 %214  ;;  %v1562_v41 = vpop.permute.xlu0 %230 }
  0x86   :  { %v242_v55 = vsub.f32 %v1568_v47, %v215_v40  ;;  %v257_v63 = vmul.f32 %v249_v54, %v241_v51  ;;  %v259_v31 = vmul.f32 %v251_v23, %v243_v13 }
  0x88   :  { %v250_v61 = vmul.f32 -0.5, %v242_v55 }
  0x8a   :  { %v99_v44 = vpop.permute.xlu1 %98  ;;  %v84_v45 = vpop.permute.xlu0 %83  ;;  %v258_v6 = vmul.f32 %v250_v61, %v242_v55 }
  0x8b   :  { %v121_v46 = vsub.f32 %v1565_v43, %v84_v45  ;;  %v124_v27 = vsub.f32 %v1565_v43, %v99_v44 }
  0x8d   :  { %v129_v48 = vmul.f32 -0.5, %v121_v46  ;;  %v132_v35 = vmul.f32 -0.5, %v124_v27 }
  0x8e   :  { %v89_v49 = vpop.permute.xlu0 %88 }
  0x8f   :  { %v223_v50 = vpop.permute.xlu1 %222  ;;  %v137_v52 = vmul.f32 %v129_v48, %v121_v46  ;;  %v122_v56 = vsub.f32 %v1565_v43, %v89_v49 }
  0x90   :  { %v244_v38 = vsub.f32 %v1568_v47, %v223_v50 }
  0x91   :  { %v130_v62 = vmul.f32 -0.5, %v122_v56 }
  0x92   :  { %v94_v53 = vpop.permute.xlu0 %93 }
  0x93   :  { %v138_v7 = vmul.f32 %v130_v62, %v122_v56  ;;  %v123_v16 = vsub.f32 %v1565_v43, %v94_v53  ;;  %v252_v53 = vmul.f32 -0.5, %v244_v38 }
  0x94   :  { %v148_v57 = vpop.permute.xlu1 %147 }
  0x95   :  { %v185_v58 = vmul.f32 %v148_v57, %v137_v52  ;;  %v131_v26 = vmul.f32 -0.5, %v123_v16  ;;  %v140_v52 = vmul.f32 %v132_v35, %v124_v27 }
  0x96   :  { %v104_v59 = vpop.permute.xlu0 %103 }
  0x97   :  { %v193_v60 = vmul.f32 1.442695, %v185_v58  ;;  %v125_v24 = vsub.f32 %v1565_v43, %v104_v59  ;;  %v139_v34 = vmul.f32 %v131_v26, %v123_v16  ;;  %v260_v59 = vmul.f32 %v252_v53, %v244_v38 }
  0x99   :  { %1357 = vpow2.f32 %v193_v60  ;;  %v267_v1 = vpop.permute.xlu1 %266  ;;  %v133_v30 = vmul.f32 -0.5, %v125_v24 }
  0x9a   :  { %v297_v2 = vmul.f32 %v267_v1, %v257_v63  ;;  %v1573_v3 = vpop.permute.xlu0 %118 }
  0x9b   :  { %v141_v40 = vmul.f32 %v133_v30, %v125_v24  ;;  %v128_v38 = vsub.f32 %v1565_v43, %v1573_v3 }
  0x9c   :  { %v305_v5 = vmul.f32 1.442695, %v297_v2  ;;  %v246_v2 = vsub.f32 %v1568_v47, %v1562_v41 }
  0x9d   :  { %v271_v8 = vpop.permute.xlu1 %270 }
  0x9e   :  { %1359 = vpow2.f32 %v305_v5  ;;  %v298_v11 = vmul.f32 %v271_v8, %v258_v6  ;;  %v254_v13 = vmul.f32 -0.5, %v246_v2 }
  0x9f   :  { %v153_v12 = vpop.permute.xlu0 %152 }
  0xa0   :  { %v307_v14 = vmul.f32 1.442695, %v298_v11  ;;  %v186_v15 = vmul.f32 %v153_v12, %v138_v7  ;;  %v262_v24 = vmul.f32 %v254_v13, %v246_v2 }
  0xa2   :  { %1361 = vpow2.f32 %v307_v14  ;;  %v195_v17 = vmul.f32 1.442695, %v186_v15  ;;  %v109_v18 = vpop.permute.xlu1 %108 }
  0xa3   :  { %v1577_v20 = vpop.eup %1357  ;;  %v168_v22 = vpop.permute.xlu0 %167  ;;  %v126_v8 = vsub.f32 %v1565_v43, %v109_v18 }
  0xa4   :  { %1363 = vpow2.f32 %v195_v17  ;;  %v354_v25 = vsel %vm353_vm0, %v1577_v20, 0.0  ;;  %v189_v54 = vmul.f32 %v168_v22, %v141_v40 }
  0xa5   :  { %355 = vadd.xlane.f32.xlu0 %v354_v25  ;;  %v134_v41 = vmul.f32 -0.5, %v126_v8 }
  0xa6   :  { %v201_v58 = vmul.f32 1.442695, %v189_v54 }
  0xa7   :  { %v227_v28 = vpop.permute.xlu1 %226 }
  0xa8   :  { %v1360_v29 = vpop.eup %1359  ;;  %v275_v32 = vpop.permute.xlu0 %274  ;;  %v245_v22 = vsub.f32 %v1568_v47, %v227_v28 }
  0xa9   :  { %v379_v33 = vsel %vm378_vm1, %v1360_v29, 0.0  ;;  %v299_v42 = vmul.f32 %v275_v32, %v259_v31  ;;  %v142_v29 = vmul.f32 %v134_v41, %v126_v8 }
  0xaa   :  { %380 = vadd.xlane.f32.xlu0 %v379_v33  ;;  %v253_v30 = vmul.f32 -0.5, %v245_v22 }
  0xab   :  { %v309_v55 = vmul.f32 1.442695, %v299_v42 }
  0xac   :  { %v1362_v37 = vpop.eup %1361  ;;  %v158_v45 = vpop.permute.xlu1 %157 }
  0xad   :  { %v187_v46 = vmul.f32 %v158_v45, %v139_v34  ;;  %v382_v48 = vsel %vm378_vm1, %v1362_v37, 0.0  ;;  %v287_v23 = vpop.permute.xlu0 %286  ;;  %v261_v37 = vmul.f32 %v253_v30, %v245_v22 }
  0xae   :  { %v1586_v44 = vpop.eup %1363  ;;  %383 = vadd.xlane.f32.xlu0 %v382_v48  ;;  %v302_v27 = vmul.f32 %v287_v23, %v262_v24 }
  0xaf   :  { %v197_v49 = vmul.f32 1.442695, %v187_v46  ;;  %v357_v51 = vsel %vm353_vm0, %v1586_v44, 0.0 }
  0xb0   :  { %358 = vadd.xlane.f32.xlu1 %v357_v51  ;;  %v163_v56 = vpop.permute.xlu1 %162  ;;  %v315_v28 = vmul.f32 1.442695, %v302_v27  ;;  %v136_v51 = vmul.f32 -0.5, %v128_v38 }
  0xb1   :  { %v188_v50 = vmul.f32 %v163_v56, %v140_v52  ;;  %1365 = vpow2.f32 %v197_v49  ;;  %v291_v46 = vpop.permute.xlu0 %290 }
  0xb2   :  { %1367 = vpow2.f32 %v309_v55 }
  0xb3   :  { %v199_v57 = vmul.f32 1.442695, %v188_v50 }
  0xb5   :  { %1369 = vpow2.f32 %v199_v57  ;;  %v279_v60 = vpop.permute.xlu1 %278 }
  0xb6   :  { %v300_v61 = vmul.f32 %v279_v60, %v260_v59  ;;  %1371 = vpow2.f32 %v201_v58  ;;  %v144_v58 = vmul.f32 %v136_v51, %v128_v38 }
  0xb8   :  { %v311_v62 = vmul.f32 1.442695, %v300_v61 }
  0xba   :  { %1373 = vpow2.f32 %v311_v62  ;;  %v114_v63 = vpop.permute.xlu1 %113 }
  0xbb   :  { %v1590_v1 = vpop.eup %1365  ;;  %v127_v32 = vsub.f32 %v1565_v43, %v114_v63 }
  0xbc   :  { %v360_v5 = vsel %vm353_vm0, %v1590_v1, 0.0  ;;  %v1368_v6 = vpop.eup %1367 }
  0xbd   :  { %361 = vadd.xlane.f32.xlu1 %v360_v5  ;;  %v385_v14 = vsel %vm378_vm1, %v1368_v6, 0.0  ;;  %v135_v40 = vmul.f32 -0.5, %v127_v32 }
  0xbf   :  { %v1596_v7 = vpop.eup %1369  ;;  %v235_v11 = vpop.permute.xlu1 %234  ;;  %v143_v53 = vmul.f32 %v135_v40, %v127_v32 }
  0xc0   :  { %v363_v12 = vsel %vm353_vm0, %v1596_v7, 0.0  ;;  %v1602_v15 = vpop.eup %1371  ;;  %v247_v18 = vsub.f32 %v1568_v47, %v235_v11 }
  0xc1   :  { %364 = vadd.xlane.f32.xlu0 %v363_v12  ;;  %386 = vadd.xlane.f32.xlu1 %v385_v14  ;;  %v366_v25 = vsel %vm353_vm0, %v1602_v15, 0.0 }
  0xc2   :  { %v255_v33 = vmul.f32 -0.5, %v247_v18 }
  0xc3   :  { %v239_v16 = vpop.permute.xlu1 %238 }
  0xc4   :  { %v1374_v17 = vpop.eup %1373  ;;  %v263_v42 = vmul.f32 %v255_v33, %v247_v18  ;;  %v248_v54 = vsub.f32 %v1568_v47, %v239_v16 }
  0xc5   :  { %v388_v26 = vsel %vm378_vm1, %v1374_v17, 0.0  ;;  %367 = vadd.xlane.f32.xlu1 %v366_v25  ;;  %v412_v25 = vpop.permute.xlu0 %411 }
  0xc6   :  { %389 = vadd.xlane.f32.xlu0 %v388_v26  ;;  %v303_v52 = vmul.f32 %v291_v46, %v263_v42  ;;  %v256_v43 = vmul.f32 -0.5, %v248_v54 }
  0xc8   :  { %v173_v31 = vpop.permute.xlu1 %172  ;;  %v317_v50 = vmul.f32 1.442695, %v303_v52  ;;  %v264_v47 = vmul.f32 %v256_v43, %v248_v54 }
  0xc9   :  { %v190_v34 = vmul.f32 %v173_v31, %v142_v29  ;;  %v1638_v31 = vshrl.u32 %v63_v36, 7 }
  0xcb   :  { %v203_v35 = vmul.f32 1.442695, %v190_v34  ;;  %vm708_vm10 = vcmp.eq.s32.totalorder %v1638_v31, %v1560_v39 }
  0xcd   :  { %1375 = vpow2.f32 %v203_v35  ;;  %v283_v45 = vpop.permute.xlu1 %282 }
  0xce   :  { %v301_v48 = vmul.f32 %v283_v45, %v261_v37  ;;  %1377 = vpow2.f32 %v315_v28 }
  0xd0   :  { %v313_v49 = vmul.f32 1.442695, %v301_v48 }
  0xd2   :  { %1379 = vpow2.f32 %v313_v49  ;;  %v178_v55 = vpop.permute.xlu1 %177 }
  0xd3   :  { %v191_v56 = vmul.f32 %v178_v55, %v143_v53 }
  0xd5   :  { %v205_v57 = vmul.f32 1.442695, %v191_v56 }
  0xd6   :  { %v183_v3 = vpop.permute.xlu1 %182 }
  0xd7   :  { %v1613_v59 = vpop.eup %1375  ;;  %1381 = vpow2.f32 %v205_v57  ;;  %v192_v60 = vmul.f32 %v183_v3, %v144_v58 }
  0xd8   :  { %v369_v61 = vsel %vm353_vm0, %v1613_v59, 0.0  ;;  %v1378_v62 = vpop.eup %1377  ;;  %1383 = vpow2.f32 %v317_v50 }
  0xd9   :  { %v207_v63 = vmul.f32 1.442695, %v192_v60  ;;  %370 = vadd.xlane.f32.xlu0 %v369_v61  ;;  %v394_v8 = vsel %vm378_vm1, %v1378_v62, 0.0 }
  0xdb   :  { %1385 = vpow2.f32 %v207_v63  ;;  %v295_v2 = vpop.permute.xlu1 %294 }
  0xdc   :  { %v1380_v5 = vpop.eup %1379  ;;  %v304_v6 = vmul.f32 %v295_v2, %v264_v47 }
  0xdd   :  { %395 = vadd.xlane.f32.xlu0 %v394_v8  ;;  %v391_v11 = vsel %vm378_vm1, %v1380_v5, 0.0 }
  0xde   :  { %v319_v12 = vmul.f32 1.442695, %v304_v6  ;;  %392 = vadd.xlane.f32.xlu1 %v391_v11  ;;  %v35_v11 = vld [vmem:[%s1843_s1] sm:$0xff] }
  0xdf   :  { %v410_v18 = vpop.permute.xlu1 %409 }
  0xe0   :  { %1387 = vpow2.f32 %v319_v12  ;;  %v60_v12 = vmul.f32 64.0, %v35_v11 }
  0xe1   :  { %v1619_v13 = vpop.eup %1381 }
  0xe2   :  { %v372_v14 = vsel %vm353_vm0, %v1619_v13, 0.0  ;;  %v1384_v41 = vpop.eup %1383 }
  0xe3   :  { %373 = vadd.xlane.f32.xlu1 %v372_v14  ;;  %v397_v17 = vsel %vm378_vm1, %v1384_v41, 0.0  ;;  %v414_v27 = vpop.permute.xlu1 %413 }
  0xe5   :  { %v1623_v16 = vpop.eup %1385 }
  0xe6   :  { %v375_v22 = vsel %vm353_vm0, %v1623_v16, 0.0 }
  0xe7   :  { %398 = vadd.xlane.f32.xlu1 %v397_v17  ;;  %376 = vadd.xlane.f32.xlu0 %v375_v22  ;;  %v416_v32 = vpop.permute.xlu1 %415  ;;  %v61_v22 = vmax.f32 %v60_v12, 1.0 }
  0xea   :  { %v1388_v23 = vpop.eup %1387 }
  0xeb   :  { %v400_v24 = vsel %vm378_vm1, %v1388_v23, 0.0 }
  0xec   :  { %401 = vadd.xlane.f32.xlu0 %v400_v24 }
  0xf8   :  { %419 = vrot.lane.b32.xlu1 %v1489_v4, %s1425_s0 }
  0xfc   :  { %423 = vrot.lane.b32.xlu1 %v1525_v19, %s1425_s0  ;;  %v406_v19 = vsub.s32 0, %v1638_v31 }
 0x102   :  { %417 = vrot.lane.b32.xlu0 %v1511_v10, %s1425_s0  ;;  %v1644_v10 = vld [vmem:[%s1842_s6] sm:$0x1] }
 0x103   :  { %v1649_v35 = vrot.slane %v1644_v10, %v406_v19 }
 0x105   :  { %v433_v36 = vmul.f32 %v410_v18, %v1649_v35  ;;  %v434_v40 = vmul.f32 %v412_v25, %v1649_v35  ;;  %v435_v56 = vmul.f32 %v414_v27, %v1649_v35  ;;  %v436_v58 = vmul.f32 %v416_v32, %v1649_v35 }
 0x106   :  { %421 = vrot.lane.b32.xlu0 %v1530_v21, %s1425_s0  ;;  %v1660_v27 = vadd.s32 8, %v1638_v31  ;;  %v323_v32 = vsub.s32 1, %v1638_v31 }
 0x108   :  { %vm709_vm12 = vcmp.eq.s32.totalorder %v1660_v27, %v1560_v39 }
 0x132   :  { %v356_v26 = vpop.xlane.xlu0 %355 }
 0x137   :  { %v381_v29 = vpop.xlane.xlu0 %380 }
 0x138   :  { %v441_v30 = vmul.f32 %v381_v29, %v356_v26 }
 0x13a   :  { %v449_v4 = vadd.f32 1e-05, %v441_v30  ;;  %v73_v30 = vcvt.s32.f32 %v1638_v31 }
 0x13b   :  { %v384_v33 = vpop.xlane.xlu0 %383 }
 0x13c   :  { %1389 = vrcp.f32 %v449_v4 }
 0x13d   :  { %v359_v34 = vpop.xlane.xlu1 %358 }
 0x13e   :  { %v442_v21 = vmul.f32 %v384_v33, %v359_v34  ;;  %v74_v33 = vcvt.s32.f32 %v1660_v27 }
 0x140   :  { %v450_v28 = vadd.f32 1e-05, %v442_v21  ;;  %v1666_v21 = vadd.s32 16, %v1638_v31 }
 0x142   :  { %1391 = vrcp.f32 %v450_v28  ;;  %v77_v28 = vmul.f32 0.53333336, %v73_v30  ;;  %vm710_vm11 = vcmp.eq.s32.totalorder %v1666_v21, %v1560_v39 }
 0x146   :  { %v1390_v37 = vpop.eup %1389 }
 0x147   :  { %v465_v38 = vmul.f32 %v1390_v37, %v433_v36  ;;  %v324_v36 = vrot.slane %v35_v11, %v323_v32 }
 0x149   :  { %475 = vperm.xlu0 %1336, %v465_v38   ;;  %v1669_v38 = vadd.s32 24, %v1638_v31 }
 0x14a   :  { %v362_v42 = vpop.xlane.xlu1 %361 }
 0x14b   :  { %vm711_vm13 = vcmp.eq.s32.totalorder %v1669_v38, %v1560_v39 }
 0x14c   :  { %v1392_v45 = vpop.eup %1391 }
 0x14d   :  { %v466_v46 = vmul.f32 %v1392_v45, %v434_v40  ;;  %v78_v40 = vmul.f32 0.53333336, %v74_v33  ;;  %v75_v45 = vcvt.s32.f32 %v1666_v21 }
 0x14e   :  { %v365_v48 = vpop.xlane.xlu0 %364  ;;  %v387_v49 = vpop.xlane.xlu1 %386 }
 0x14f   :  { %480 = vperm.xlu1 %1337, %v466_v46   ;;  %v443_v51 = vmul.f32 %v387_v49, %v362_v42  ;;  %v325_v46 = vsub.f32 %v77_v28, %v324_v36  ;;  %v76_v49 = vcvt.s32.f32 %v1669_v38 }
 0x151   :  { %v451_v52 = vadd.f32 1e-05, %v443_v51  ;;  %v326_v51 = vsub.f32 %v78_v40, %v324_v36 }
 0x152   :  { %v368_v61 = vpop.xlane.xlu1 %367 }
 0x153   :  { %v390_v53 = vpop.xlane.xlu0 %389  ;;  %1393 = vrcp.f32 %v451_v52 }
 0x154   :  { %v444_v54 = vmul.f32 %v390_v53, %v365_v48  ;;  %v79_v53 = vmul.f32 0.53333336, %v75_v45 }
 0x156   :  { %v452_v55 = vadd.f32 1e-05, %v444_v54  ;;  %v329_v54 = vmul.f32 -0.5, %v325_v46 }
 0x158   :  { %1395 = vrcp.f32 %v452_v55  ;;  %v339_v55 = vsub.s32 3, %v1638_v31  ;;  %v672_v31 = vld [vmem:[%s1846_s2 + $0x1] sm:$0x1] }
 0x15d   :  { %v1394_v50 = vpop.eup %1393 }
 0x15e   :  { %v467_v57 = vmul.f32 %v1394_v50, %v435_v56 }
 0x160   :  { %485 = vperm.xlu1 %1337, %v467_v57   ;;  %v80_v57 = vmul.f32 0.53333336, %v76_v49 }
 0x162   :  { %v1396_v43 = vpop.eup %1395 }
 0x163   :  { %v468_v3 = vmul.f32 %v1396_v43, %v436_v58  ;;  %v330_v58 = vmul.f32 -0.5, %v326_v51 }
 0x165   :  { %490 = vperm.xlu0 %1336, %v468_v3  }
 0x166   :  { %v371_v60 = vpop.xlane.xlu0 %370 }
 0x16a   :  { %v396_v62 = vpop.xlane.xlu0 %395 }
 0x16b   :  { %v446_v63 = vmul.f32 %v396_v62, %v371_v60  ;;  %v393_v47 = vpop.xlane.xlu1 %392  ;;  %v327_v60 = vsub.f32 %v79_v53, %v324_v36 }
 0x16c   :  { %v445_v5 = vmul.f32 %v393_v47, %v368_v61  ;;  %v333_v61 = vmul.f32 %v329_v54, %v325_v46  ;;  %v328_v47 = vsub.f32 %v80_v57, %v324_v36 }
 0x16d   :  { %v454_v2 = vadd.f32 1e-05, %v446_v63 }
 0x16e   :  { %v453_v8 = vadd.f32 1e-05, %v445_v5  ;;  %v332_v12 = vmul.f32 -0.5, %v328_v47 }
 0x16f   :  { %1397 = vrcp.f32 %v454_v2  ;;  %v334_v2 = vmul.f32 %v330_v58, %v326_v51 }
 0x170   :  { %v374_v6 = vpop.xlane.xlu1 %373  ;;  %1399 = vrcp.f32 %v453_v8 }
 0x171   :  { %1401 = vrcp.f32 %v61_v22  ;;  %v336_v22 = vmul.f32 %v332_v12, %v328_v47 }
 0x174   :  { %v377_v14 = vpop.xlane.xlu0 %376  ;;  %v399_v41 = vpop.xlane.xlu1 %398 }
 0x175   :  { %v447_v17 = vmul.f32 %v399_v41, %v374_v6  ;;  %v331_v6 = vmul.f32 -0.5, %v327_v60 }
 0x177   :  { %v455_v23 = vadd.f32 1e-05, %v447_v17  ;;  %v335_v41 = vmul.f32 %v331_v6, %v327_v60 }
 0x178   :  { %v420_v24 = vpop.permute.xlu1 %419 }
 0x179   :  { %v1398_v18 = vpop.eup %1397  ;;  %1403 = vrcp.f32 %v455_v23  ;;  %v438_v25 = vmul.f32 %v420_v24, %v1649_v35  ;;  %v402_v26 = vpop.xlane.xlu0 %401 }
 0x17a   :  { %v448_v29 = vmul.f32 %v402_v26, %v377_v14  ;;  %v1400_v48 = vpop.eup %1399 }
 0x17b   :  { %v470_v4 = vmul.f32 %v1398_v18, %v438_v25  ;;  %v1402_v56 = vpop.eup %1401 }
 0x17c   :  { %v456_v34 = vadd.f32 1e-05, %v448_v29  ;;  %v424_v3 = vpop.permute.xlu1 %423  ;;  %v340_v62 = vrot.slane %v1402_v56, %v339_v55 }
 0x17d   :  { %v418_v37 = vpop.permute.xlu0 %417  ;;  %500 = vperm.xlu0 %1336, %v470_v4   ;;  %v440_v11 = vmul.f32 %v424_v3, %v1649_v35 }
 0x17e   :  { %1405 = vrcp.f32 %v456_v34  ;;  %v437_v42 = vmul.f32 %v418_v37, %v1649_v35  ;;  %v341_v8 = vmul.f32 %v340_v62, %v333_v61  ;;  %v342_v14 = vmul.f32 %v340_v62, %v334_v2 }
 0x17f   :  { %v343_v24 = vmul.f32 %v340_v62, %v335_v41  ;;  %v344_v25 = vmul.f32 %v340_v62, %v336_v22 }
 0x180   :  { %v469_v52 = vmul.f32 %v1400_v48, %v437_v42  ;;  %v345_v17 = vmul.f32 1.442695, %v341_v8  ;;  %v347_v45 = vmul.f32 1.442695, %v342_v14 }
 0x181   :  { %v422_v50 = vpop.permute.xlu0 %421  ;;  %v351_v48 = vmul.f32 1.442695, %v344_v25 }
 0x182   :  { %v439_v43 = vmul.f32 %v422_v50, %v1649_v35  ;;  %495 = vperm.xlu1 %1337, %v469_v52   ;;  %1407 = vpow2.f32 %v345_v17 }
 0x183   :  { %v1404_v63 = vpop.eup %1403  ;;  %1409 = vpow2.f32 %v347_v45 }
 0x184   :  { %v471_v5 = vmul.f32 %v1404_v63, %v439_v43 }
 0x186   :  { %505 = vperm.xlu1 %1337, %v471_v5  }
 0x188   :  { %v1406_v23 = vpop.eup %1405 }
 0x189   :  { %v472_v18 = vmul.f32 %v1406_v23, %v440_v11 }
 0x18a   :  { %1338 = vset.pattern.permute.xlu1 %v1422_v9 }
 0x18b   :  { %510 = vperm.xlu0 %1336, %v472_v18   ;;  %522 = vperm.xlu1 %1338, %v1649_v35  }
 0x18c   :  { %v1408_v26 = vpop.eup %1407 }
 0x18d   :  { %1193 = vmatprep.mubr.msk.f32.mxu0 %vm525_vm2, %v1408_v26 }
 0x18f   :  { %1339 = vset.pattern.permute.xlu1 %v1421_v0  ;;  %1340 = vset.pattern.permute.xlu0 %v1421_v0 }
 0x1c8   :  { %v476_v29 = vpop.permute.xlu0 %475 }
 0x1c9   :  { %v513_v32 = vmul.f32 %v1577_v20, %v476_v29 }
 0x1ce   :  { %v481_v30 = vpop.permute.xlu1 %480 }
 0x1cf   :  { %v514_v4 = vmul.f32 %v1586_v44, %v481_v30  ;;  %v349_v44 = vmul.f32 1.442695, %v343_v24 }
 0x1d1   :  { %v1255_v33 = vpack.c.bf16 %v514_v4, %v513_v32  ;;  %1411 = vpow2.f32 %v349_v44 }
 0x1d2   :  { %1413 = vpow2.f32 %v351_v48 }
 0x1d3   :  { %1256 = vmatprep.subr.bf16.mxu0 %v1255_v33 }
 0x1d4   :  { %1258 = vmatpush3.bf16.msra.mxu0 %v1255_v33 }
 0x1df   :  { %v486_v9 = vpop.permute.xlu1 %485 }
 0x1e0   :  { %v515_v28 = vmul.f32 %v1590_v1, %v486_v9 }
 0x1e4   :  { %v491_v34 = vpop.permute.xlu0 %490 }
 0x1e5   :  { %v516_v36 = vmul.f32 %v1596_v7, %v491_v34 }
 0x1e7   :  { %v1259_v0 = vpack.c.bf16 %v516_v36, %v515_v28 }
 0x1e9   :  { %1260 = vmatprep.subr.bf16.mxu0 %v1259_v0 }
 0x1ea   :  { %1262 = vmatpush3.bf16.msra.mxu0 %v1259_v0 }
 0x1fc   :  { %v501_v37 = vpop.permute.xlu0 %500 }
 0x1fd   :  { %v518_v42 = vmul.f32 %v1613_v59, %v501_v37  ;;  %v1410_v59 = vpop.eup %1409 }
 0x201   :  { %v496_v40 = vpop.permute.xlu1 %495 }
 0x202   :  { %v517_v20 = vmul.f32 %v1602_v15, %v496_v40  ;;  %v1412_v15 = vpop.eup %1411 }
 0x203   :  { %v1414_v53 = vpop.eup %1413 }
 0x204   :  { %v1263_v46 = vpack.c.bf16 %v518_v42, %v517_v20 }
 0x205   :  { %v506_v1 = vpop.permute.xlu1 %505 }
 0x206   :  { %1264 = vmatprep.subr.bf16.mxu0 %v1263_v46  ;;  %v519_v7 = vmul.f32 %v1619_v13, %v506_v1 }
 0x207   :  { %1266 = vmatpush3.bf16.msra.mxu0 %v1263_v46 }
 0x20a   :  { %v511_v49 = vpop.permute.xlu0 %510  ;;  %v523_v54 = vpop.permute.xlu1 %522 }
 0x20b   :  { %v520_v51 = vmul.f32 %v1623_v16, %v511_v49 }
 0x20d   :  { %v1267_v52 = vpack.c.bf16 %v520_v51, %v519_v7 }
 0x20f   :  { %1268 = vmatprep.subr.bf16.mxu0 %v1267_v52 }
 0x210   :  { %1270 = vmatpush3.bf16.msra.mxu0 %v1267_v52 }
 0x213   :  { %1194 = vmatmul.mubr.msk.f32.vlgmr.msra.gmra.mrb[0].mxu0 %vm525_vm2, %v1410_v59 }
 0x214   :  { %1196 = vmatprep.mubr.msk.f32.mxu0 %vm525_vm2, %v1412_v15 }
 0x217   :  { %1197 = vmatmul.mubr.msk.f32.gmra.mrb[2].mxu0 %vm525_vm2, %v1414_v53 }
 0x2e6   :  { %v1195_v55 = vpop.f32.mrb[0].mxu0 }
 0x2e7   :  { %v610_v56 = vadd.f32 %v1195_v55, %v523_v54  ;;  %v604_v50 = vpop.f32.mrb[1].mxu0 }
 0x2e8   :  { %v605_v57 = vadd.f32 %v604_v50, %v523_v54 }
 0x2e9   :  { %v642_v43 = vsel %vm353_vm0, %v610_v56, -inf  ;;  %v624_v62 = vsel %vm353_vm0, %v610_v56, inf }
 0x2ea   :  { %v1198_v13 = vpop.f32.mrb[2].mxu0  ;;  %v641_v60 = vsel %vm353_vm0, %v605_v57, -inf  ;;  %v623_v61 = vsel %vm353_vm0, %v605_v57, inf }
 0x2eb   :  { %v620_v16 = vadd.f32 %v1198_v13, %v523_v54  ;;  %v614_v58 = vpop.f32.mrb[3].mxu0  ;;  %v645_v6 = vmax.f32 %v641_v60, %v642_v43  ;;  %v628_v11 = vmin.f32 %v623_v61, %v624_v62  ;;  %v759_v43 = vld [vmem:[%s1844_s3] sm:$0xff]  ;;  %v1426_v62 = vmov 0.0|0.0  }
 0x2ec   :  { %v615_v3 = vadd.f32 %v614_v58, %v523_v54  ;;  %1271 = vmatprep.subr.bf16.mxu1 %v1426_v62  ;;  %1289 = vmatprep.subr.bf16.mxu0 %v1426_v62 }
 0x2ed   :  { %v644_v63 = vsel %vm626_vm3, %v620_v16, -inf  ;;  %v627_v47 = vsel %vm626_vm3, %v620_v16, inf }
 0x2ee   :  { %v643_v2 = vsel %vm353_vm0, %v615_v3, -inf  ;;  %v625_v5 = vsel %vm353_vm0, %v615_v3, inf }
 0x2ef   :  { %v646_v8 = vmax.f32 %v643_v2, %v644_v63  ;;  %v629_v12 = vmin.f32 %v625_v5, %v627_v47  ;;  %v761_v47 = vld [vmem:[%s1844_s3 + $0x10] sm:$0xff]  ;;  %v762_v2 = vld [vmem:[%s1844_s3 + $0x18] sm:$0xff] }
 0x2f0   :  { %v1275_v5 = vpack.c.bf16 %v762_v2, %v761_v47  ;;  %v771_v47 = vld [vmem:[%s1847_s5 + $0x28] sm:$0xff] }
 0x2f1   :  { %v647_v14 = vmax.f32 %v645_v6, %v646_v8  ;;  %v630_v41 = vmin.f32 %v628_v11, %v629_v12  ;;  %v763_v6 = vld [vmem:[%s1844_s3 + $0x20] sm:$0xff]  ;;  %v1427_v11 = vmov 0.0   ;;  %v765_v12 = vld [vmem:[%s1844_s3 + $0x30] sm:$0x7] }
 0x2f2   :  { %1213 = vmatprep.mubr.msk.f32.mxu1 %vm1428_vm6, %v1427_v11  ;;  %1241 = vmatprep.mubr.msk.f32.mxu0 %vm1428_vm6, %v1427_v11 }
 0x2f3   :  { %648 = vmax.xlane.f32.xlu1 %v647_v14  ;;  %631 = vmin.xlane.f32.xlu0 %v630_v41  ;;  %v940_v14 = vld [vmem:[%s1845_s4] sm:$0xff] }
 0x380   :  { %v649_v17 = vpop.xlane.xlu1 %648  ;;  %v632_v22 = vpop.xlane.xlu0 %631 }
 0x381   :  { %v650_v23 = vrot.slane %v649_v17, 4  ;;  %v633_v24 = vrot.slane %v632_v22, 4 }
 0x383   :  { %v651_v18 = vmax.f32 %v649_v17, %v650_v23  ;;  %v634_v25 = vmin.f32 %v632_v22, %v633_v24  ;;  %v942_v17 = vld [vmem:[%s1845_s4 + $0x10] sm:$0xff]  ;;  %v943_v22 = vld [vmem:[%s1845_s4 + $0x18] sm:$0x7f] }
 0x384   :  { %v1293_v23 = vpack.c.bf16 %v943_v22, %v942_v17  ;;  %v947_v17 = vld [vmem:[%s1847_s5 + $0x50] sm:$0x7f] }
 0x385   :  { %v652_v26 = vrot.slane %v651_v18, 2  ;;  %v635_v29 = vrot.slane %v634_v25, 2 }
 0x387   :  { %v636_v30 = vmin.f32 %v634_v25, %v635_v29  ;;  %v653_v32 = vmax.f32 %v651_v18, %v652_v26  ;;  %v1123_v26 = vsel %vm708_vm10, 1.0, %v1427_v11 }
 0x389   :  { %v637_v4 = vrot.slane %v636_v30, 1  ;;  %v654_v33 = vrot.slane %v653_v32, 1 }
 0x38b   :  { %v638_v9 = vmin.f32 %v636_v30, %v637_v4  ;;  %v655_v34 = vmax.f32 %v653_v32, %v654_v33  ;;  %v1125_v32 = vsel %vm710_vm11, 1.0, %v1427_v11  ;;  %v1124_v4 = vsel %vm709_vm12, 1.0, %v1427_v11 }
 0x38d   :  { %1303 = vpush %v638_v9 }
 0x38e   :  { %1305 = vpush %v655_v34 }
 0x3be   :  { %s1304_s1 = spop %1303 }
 0x3bf   :  { %v640_v28 = vstv %s1304_s1  ;;  %s1306_s20 = spop %1305 }
 0x3c0   :  { %v657_v36 = vstv %s1306_s20  ;;  %v665_v42 = vsub.f32 %v615_v3, %v640_v28  ;;  %v663_v20 = vsub.f32 %v605_v57, %v640_v28  ;;  %v664_v45 = vsub.f32 %v610_v56, %v640_v28  ;;  %v760_v3 = vld [vmem:[%s1844_s3 + $0x8] sm:$0xff] }
 0x3c1   :  { %v658_v0 = vsub.f32 %v657_v36, %v640_v28  ;;  %v666_v49 = vsub.f32 %v620_v16, %v640_v28  ;;  %v1272_v60 = vpack.c.bf16 %v760_v3, %v759_v43 }
 0x3c3   :  { %v660_v37 = vmax.f32 %v658_v0, 1e-30  ;;  %vm659_vm4 = vcmp.gt.f32.partialorder %v658_v0, 0.0  ;;  %1273 = vmatpush3.bf16.msra.mxu1 %v1272_v60  ;;  %v1126_v0 = vsel %vm711_vm13, 1.0, %v1427_v11 }
 0x3c4   :  { %1274 = vmatprep.subr.bf16.mxu1 %v1426_v62 }
 0x3c5   :  { %1415 = vrcp.f32 %v660_v37 }
 0x3c7   :  { %1276 = vmatpush3.bf16.msra.mxu1 %v1275_v5  ;;  %v772_v5 = vld [vmem:[%s1847_s5 + $0x30] sm:$0x7] }
 0x3c8   :  { %1277 = vmatprep.subr.bf16.mxu1 %v1426_v62 }
 0x3cf   :  { %v1416_v40 = vpop.eup %1415 }
 0x3d0   :  { %v662_v44 = vsel %vm659_vm4, %v1416_v40, 0.0 }
 0x3d1   :  { %v669_v46 = vmul.f32 %v665_v42, %v662_v44  ;;  %v667_v48 = vmul.f32 %v663_v20, %v662_v44  ;;  %v668_v1 = vmul.f32 %v664_v45, %v662_v44  ;;  %v670_v59 = vmul.f32 %v666_v49, %v662_v44 }
 0x3d3   :  { %v676_v7 = vsel %vm353_vm0, %v669_v46, 0.0  ;;  %v673_v51 = vsel %vm353_vm0, %v667_v48, 0.0  ;;  %v674_v52 = vsel %vm353_vm0, %v668_v1, 0.0  ;;  %v678_v54 = vsel %vm626_vm3, %v670_v59, 0.0 }
 0x3d4   :  { %700 = vadd.xlane.f32.xlu1 %v676_v7  ;;  %696 = vadd.xlane.f32.xlu0 %v673_v51  ;;  %v675_v15 = vadd.f32 %v674_v52, %v673_v51  ;;  %v671_v51 = vld [vmem:[%s1846_s2] sm:$0x1] }
 0x3d6   :  { %v677_v53 = vadd.f32 %v676_v7, %v675_v15 }
 0x3d8   :  { %698 = vadd.xlane.f32.xlu0 %v674_v52  ;;  %v679_v55 = vadd.f32 %v678_v54, %v677_v53 }
 0x3da   :  { %v680_v18 = vrot.slane %v679_v55, 4 }
 0x3dc   :  { %702 = vadd.xlane.f32.xlu0 %v678_v54  ;;  %v681_v25 = vadd.f32 %v680_v18, %v679_v55 }
 0x3de   :  { %v682_v30 = vrot.slane %v681_v25, 2 }
 0x3e0   :  { %v683_v28 = vadd.f32 %v682_v30, %v681_v25 }
 0x3e2   :  { %v684_v44 = vrot.slane %v683_v28, 1 }
 0x3e4   :  { %v685_v1 = vadd.f32 %v684_v44, %v683_v28 }
 0x461   :  { %v697_v56 = vpop.xlane.xlu0 %696  ;;  %v701_v57 = vpop.xlane.xlu1 %700 }
 0x462   :  { %v704_v50 = vmul.f32 %v697_v56, %v1649_v35  ;;  %v706_v16 = vmul.f32 %v701_v57, %v1649_v35  ;;  %v767_v57 = vld [vmem:[%s1847_s5 + $0x8] sm:$0xff] }
 0x464   :  { %722 = vperm.xlu1 %1339, %v704_v50   ;;  %v766_v50 = vld [vmem:[%s1847_s5] sm:$0xff] }
 0x465   :  { %v699_v13 = vpop.xlane.xlu0 %698 }
 0x466   :  { %v705_v58 = vmul.f32 %v699_v13, %v1649_v35  ;;  %v768_v13 = vld [vmem:[%s1847_s5 + $0x10] sm:$0xff] }
 0x468   :  { %732 = vperm.xlu1 %1339, %v706_v16   ;;  %727 = vperm.xlu0 %1340, %v705_v58   ;;  %v1281_v16 = vpack.c.bf16 %v767_v57, %v766_v50  ;;  %v769_v58 = vld [vmem:[%s1847_s5 + $0x18] sm:$0xff] }
 0x469   :  { %v703_v61 = vpop.xlane.xlu0 %702  ;;  %v1284_v43 = vpack.c.bf16 %v769_v58, %v768_v13 }
 0x46a   :  { %v707_v63 = vmul.f32 %v703_v61, %v1649_v35  ;;  %v764_v35 = vld [vmem:[%s1844_s3 + $0x28] sm:$0xff] }
 0x46b   :  { %v1278_v8 = vpack.c.bf16 %v764_v35, %v763_v6  ;;  %v944_v35 = vld [vmem:[%s1847_s5 + $0x38] sm:$0xff] }
 0x46c   :  { %737 = vperm.xlu1 %1339, %v707_v63   ;;  %v770_v63 = vld [vmem:[%s1847_s5 + $0x20] sm:$0xff] }
 0x46d   :  { %1279 = vmatpush3.bf16.msra.mxu1 %v1278_v8  ;;  %v1287_v2 = vpack.c.bf16 %v771_v47, %v770_v63  ;;  %v945_v8 = vld [vmem:[%s1847_s5 + $0x40] sm:$0xff] }
 0x46e   :  { %1211 = vmatprep.subr.mxu1 %v1427_v11 }
 0x470   :  { %687 = vperm.xlu1 %1339, %v1644_v10   ;;  %v941_v10 = vld [vmem:[%s1845_s4 + $0x8] sm:$0xff] }
 0x471   :  { %1212 = vmatpush3.msk.msra.mxu1 %vm776_vm5, %v765_v12  ;;  %v1290_v41 = vpack.c.bf16 %v941_v10, %v940_v14  ;;  %v1297_v14 = vpack.c.bf16 %v945_v8, %v944_v35 }
 0x472   :  { %1280 = vmatprep.subr.bf16.mxu1 %v1426_v62 }
 0x473   :  { %1291 = vmatpush3.bf16.msra.mxu0 %v1290_v41  ;;  %v946_v41 = vld [vmem:[%s1847_s5 + $0x48] sm:$0xff] }
 0x474   :  { %1292 = vmatprep.subr.bf16.mxu0 %v1426_v62 }
 0x477   :  { %1295 = vmatpush3.bf16.msk.msra.mxu0 %vm1755_vm9, %v1293_v23  ;;  %v1300_v23 = vpack.c.bf16 %v947_v17, %v946_v41 }
 0x478   :  { %1296 = vmatprep.subr.bf16.mxu0 %v1426_v62 }
 0x4e3   :  { %v723_v29 = vpop.permute.xlu1 %722 }
 0x4e4   :  { %v740_v33 = vmul.f32 %v1123_v26, %v723_v29 }
 0x4e6   :  { %v744_v27 = vsel %vm378_vm1, %v740_v33, 0.0 }
 0x4e7   :  { %v733_v9 = vpop.permute.xlu1 %732  ;;  %v728_v34 = vpop.permute.xlu0 %727 }
 0x4e8   :  { %v742_v36 = vmul.f32 %v1125_v32, %v733_v9  ;;  %v741_v21 = vmul.f32 %v1124_v4, %v728_v34 }
 0x4ea   :  { %v745_v37 = vsel %vm378_vm1, %v741_v21, 0.0  ;;  %v747_v20 = vsel %vm378_vm1, %v742_v36, 0.0 }
 0x4eb   :  { %v746_v40 = vadd.f32 %v745_v37, %v744_v27  ;;  %v738_v42 = vpop.permute.xlu1 %737 }
 0x4ec   :  { %v743_v45 = vmul.f32 %v1126_v0, %v738_v42 }
 0x4ed   :  { %v748_v46 = vadd.f32 %v747_v20, %v746_v40 }
 0x4ee   :  { %v750_v39 = vsel %vm749_vm14, %v743_v45, 0.0 }
 0x4ef   :  { %v751_v38 = vadd.f32 %v750_v39, %v748_v46  ;;  %v688_v48 = vpop.permute.xlu1 %687 }
 0x4f0   :  { %v693_v49 = vrot.slane %v688_v48, %v406_v19 }
 0x4f1   :  { %v752_v7 = vrot.slane %v751_v38, 4 }
 0x4f2   :  { %v694_v52 = vmul.f32 %v693_v49, %v685_v1 }
 0x4f3   :  { %v753_v59 = vadd.f32 %v752_v7, %v751_v38 }
 0x4f4   :  { %v695_v15 = vadd.f32 %v694_v52, %v671_v51 }
 0x4f5   :  { %v754_v53 = vrot.slane %v753_v59, 2 }
 0x4f6   :  { %1214 = vmatmul.mubr.msk.f32.vlgmr.msra.gmra.mrb[0].mxu1 %vm353_vm0, %v695_v15 }
 0x4f7   :  { %v755_v54 = vadd.f32 %v754_v53, %v753_v59  ;;  %1230 = vmatprep.mubr.msk.f32.mxu1 %vm1428_vm6, %v1427_v11  ;;  %1282 = vmatpush3.bf16.msra.mxu1 %v1281_v16 }
 0x4f8   :  { %1283 = vmatprep.subr.bf16.mxu1 %v1426_v62 }
 0x4f9   :  { %v756_v55 = vrot.slane %v755_v54, 1 }
 0x4fb   :  { %v757_v19 = vadd.f32 %v756_v55, %v755_v54  ;;  %1285 = vmatpush3.bf16.msra.mxu1 %v1284_v43 }
 0x4fc   :  { %1286 = vmatprep.subr.bf16.mxu1 %v1426_v62 }
 0x4fd   :  { %v758_v56 = vadd.f32 %v757_v19, %v672_v31 }
 0x4ff   :  { %1242 = vmatmul.mubr.msk.f32.vlgmr.msra.gmra.mrb[4].mxu0 %vm378_vm1, %v758_v56  ;;  %1288 = vmatpush3.bf16.msra.mxu1 %v1287_v2 }
 0x500   :  { %1252 = vmatprep.mubr.msk.f32.mxu0 %vm1428_vm6, %v1427_v11  ;;  %1228 = vmatprep.subr.mxu1 %v1427_v11 }
 0x501   :  { %1298 = vmatpush3.bf16.msra.mxu0 %v1297_v14 }
 0x502   :  { %1299 = vmatprep.subr.bf16.mxu0 %v1426_v62 }
 0x503   :  { %1229 = vmatpush3.msk.msra.mxu1 %vm776_vm5, %v772_v5 }
 0x505   :  { %1302 = vmatpush3.bf16.msk.msra.mxu0 %vm1755_vm9, %v1300_v23 }
 0x5c9   :  { %v846_v3 = vpop.f32.mrb[0].mxu1 }
 0x5ca   :  { %v1215_v60 = vpop.f32.mrb[1].mxu1  ;;  %vm850_vm15 = vcmp.gt.f32.partialorder %v846_v3, 0.0 }
 0x5cb   :  { %v851_v61 = vsel %vm850_vm15, %v846_v3, 1.0 }
 0x5cc   :  { %1417 = vrcp.f32 %v851_v61 }
 0x5d2   :  { %v1021_v6 = vpop.f32.mrb[4].mxu0 }
 0x5d3   :  { %v1243_v12 = vpop.f32.mrb[5].mxu0  ;;  %vm1025_vm2 = vcmp.gt.f32.partialorder %v1021_v6, 0.0 }
 0x5d4   :  { %v1026_v10 = vsel %vm1025_vm2, %v1021_v6, 1.0 }
 0x5d5   :  { %1419 = vrcp.f32 %v1026_v10 }
 0x5d6   :  { %v1418_v11 = vpop.eup %1417 }
 0x5d7   :  { %v853_v22 = vsel %vm850_vm15, %v1418_v11, 0.0 }
 0x5d8   :  { %855 = vrot.lane.b32.xlu1 %v853_v22, %s1430_s16 }
 0x5df   :  { %v1420_v18 = vpop.eup %1419 }
 0x5e0   :  { %v1028_v25 = vsel %vm1025_vm2, %v1420_v18, 0.0 }
 0x5e1   :  { %1030 = vrot.lane.b32.xlu1 %v1028_v25, %s1430_s16 }
 0x64a   :  { %v856_v62 = vpop.permute.xlu1 %855 }
 0x64b   :  { %v858_v26 = vmul.f32 %v856_v62, %v846_v3 }
 0x64d   :  { %v859_v29 = vmul.f32 2.0, %v858_v26 }
 0x64f   :  { %v1129_v30 = vadd.f32 -1.0, %v859_v29 }
 0x651   :  { %v1130_v32 = vclamps-f32 %v1129_v30, 1.0 }
 0x653   :  { %1231 = vmatmul.mubr.msk.f32.vlgmr.msra.gmra.mrb[2].mxu1 %vm353_vm0, %v1130_v32  ;;  %v1031_v4 = vpop.permute.xlu1 %1030 }
 0x654   :  { %v1033_v33 = vmul.f32 %v1031_v4, %v1021_v6 }
 0x656   :  { %v1034_v9 = vmul.f32 2.0, %v1033_v33 }
 0x658   :  { %v1135_v34 = vadd.f32 -1.0, %v1034_v9 }
 0x65a   :  { %v1136_v28 = vclamps-f32 %v1135_v34, 1.0 }
 0x65c   :  { %1253 = vmatmul.mubr.msk.f32.vlgmr.msra.gmra.mrb[6].mxu0 %vm378_vm1, %v1136_v28 }
 0x726   :  { %v935_v36 = vpop.f32.mrb[2].mxu1 }
 0x727   :  { %939 = vst [vmem:[%s1848_s7] sm:$0x1] %v935_v36  ;;  %v1232_v24 = vpop.f32.mrb[3].mxu1 }
 0x72f   :  { %v1110_v21 = vpop.f32.mrb[6].mxu0 }
 0x730   :  { %1114 = vst [vmem:[%s1848_s7 + $0x1] sm:$0x1] %v1110_v21  ;;  %v1254_v0 = vpop.f32.mrb[7].mxu0 }

</bundles_post_ra>
